<compile_context>
chip_gen: v7x
topology: tpu7x:2x2x1
jax: 0.10.0
libtpu: 0.0.40
codegen_flags: <defaults>
</compile_context>

<pallas_src>
import jax
import jax.numpy as jnp
from jax.experimental import pallas as pl
from jax.experimental.pallas import tpu as pltpu

_LANE = 128


def _fma_kernel(x_ref, scale_ref, bias_ref, o_ref):
    # scale/bias broadcast against the x tile: (block_rows, 1) in layout A
    # (sublane-wise) or (1, block_cols) in layout B (lane-wise). f32 math,
    # cast back to the activation dtype on store.
    o_ref[...] = (x_ref[...] * scale_ref[...] + bias_ref[...]).astype(o_ref.dtype)


def _sublane_multiple(dtype):
    # f32 -> 8, bf16 -> 16, int8/fp8 -> 32 (packed dtypes pack rows per sublane).
    return max(8, 32 // jnp.dtype(dtype).itemsize)


def _num_tensorcores():
    try:
        kind = jax.devices()[0].device_kind.lower()
        if "v7" in kind:
            return 2
    except Exception:
        pass
    return 1


def _vmem_limits():
    """(vmem_limit_bytes, pipelined-buffer byte budget) for this chip."""
    cap = None
    try:
        cap = getattr(pltpu.get_tpu_info(), "vmem_capacity_bytes", None)
    except Exception:
        cap = None
    if not cap:
        cap = 64 * 1024 * 1024                 # assume the smallest (v7x per-TC) VMEM
    limit = min(cap // 2, 64 * 1024 * 1024)    # 32 MiB on v7x, 64 MiB on v5e/v6e
    budget = min(max(limit - 8 * 1024 * 1024, 8 * 1024 * 1024), 48 * 1024 * 1024)
    return limit, budget


def frozen_batch_norm_2d(x, weight, bias, running_mean, running_var, eps=1e-5):
    """x: (N, C, H, W). FrozenBatchNorm2d forward, returns (N, C, H, W)."""
    N, C, H, W = x.shape
    hw = H * W
    itemsize = jnp.dtype(x.dtype).itemsize
    sub = _sublane_multiple(x.dtype)
    num_tc = _num_tensorcores()
    min_steps = 2 * num_tc if num_tc > 1 else 1
    vmem_limit, budget = _vmem_limits()

    # Affine transform precomputed once, in f32 (C-element cost).
    scale = (weight.astype(jnp.float32)
             * jax.lax.rsqrt(running_var.astype(jnp.float32) + eps))
    shift = bias.astype(jnp.float32) - running_mean.astype(jnp.float32) * scale

    if hw % _LANE == 0:
        # ---- Layout A: (N*C, H*W); lane axis already dense. -----------------
        rows, cols = N * C, hw
        x2 = x.reshape(rows, cols)
        scale2 = jnp.tile(scale, N).reshape(rows, 1)   # row r = (n, c), r = n*C + c
        shift2 = jnp.tile(shift, N).reshape(rows, 1)

        # Per-row VMEM: in+out x tiles double-buffered (4*cols*itemsize) plus
        # two (block_rows, 1) f32 param tiles lane-padded to 128 (2 params x 2 bufs).
        per_row_bytes = 4 * cols * itemsize + 4 * _LANE * 4
        block_rows = max(sub, budget // per_row_bytes)
        if min_steps > 1:                               # shard grid across TensorCores
            block_rows = min(block_rows, max(sub, pl.cdiv(rows, min_steps)))
        block_rows = min(block_rows, rows)
        if block_rows < rows:
            block_rows = max(sub, (block_rows // sub) * sub)

        grid = (pl.cdiv(rows, block_rows),)
        x_spec = pl.BlockSpec((block_rows, cols), lambda i: (i, 0))
        p_spec = pl.BlockSpec((block_rows, 1), lambda i: (i, 0))
        in_specs = [x_spec, p_spec, p_spec]
        out_spec = x_spec
        semantics = ("parallel",)
    else:
        # ---- Layout B: (N, C*H*W); block the lane axis in multiples of 128. -
        rows, cols = N, C * hw
        x2 = x.reshape(rows, cols)
        scale2 = jnp.repeat(scale, hw).reshape(1, cols)  # col j -> channel j // (H*W)
        shift2 = jnp.repeat(shift, hw).reshape(1, cols)

        if rows <= 256:
            block_n = rows                               # full dim: any size is legal
        else:
            block_n = (256 // sub) * sub

        # Per-lane-column VMEM: in+out x tiles double-buffered plus two
        # (1, block_cols) f32 param tiles (sublane-padded to 8, 2 params x 2 bufs).
        per_col_bytes = 4 * block_n * itemsize + 4 * 8 * 4
        block_cols = max(_LANE, (budget // per_col_bytes) // _LANE * _LANE)
        n_row_blocks = pl.cdiv(rows, block_n)
        if min_steps > 1 and n_row_blocks * pl.cdiv(cols, block_cols) < min_steps:
            want = pl.cdiv(min_steps, n_row_blocks)      # split lanes across TensorCores
            block_cols = max(_LANE, pl.cdiv(pl.cdiv(cols, want), _LANE) * _LANE)
        if block_cols >= cols:
            block_cols = cols                            # single (possibly ragged) block

        # Lane blocks on the outer grid axis, row blocks inner: the (1, block_cols)
        # param blocks keep the same block index across the inner axis, so Pallas
        # does not re-DMA them for every row block.
        grid = (pl.cdiv(cols, block_cols), pl.cdiv(rows, block_n))
        x_spec = pl.BlockSpec((block_n, block_cols), lambda ci, ni: (ni, ci))
        p_spec = pl.BlockSpec((1, block_cols), lambda ci, ni: (0, ci))
        in_specs = [x_spec, p_spec, p_spec]
        out_spec = x_spec
        semantics = ("parallel", "arbitrary")

    cost = pl.CostEstimate(
        flops=2 * x.size,
        transcendentals=0,
        bytes_accessed=2 * x.size * itemsize + (scale2.size + shift2.size) * 4,
    )

    out2 = pl.pallas_call(
        _fma_kernel,
        out_shape=jax.ShapeDtypeStruct(x2.shape, x.dtype),
        grid_spec=pltpu.PrefetchScalarGridSpec(
            num_scalar_prefetch=0,
            grid=grid,
            in_specs=in_specs,
            out_specs=out_spec,
        ),
        compiler_params=pltpu.CompilerParams(
            dimension_semantics=semantics,
            vmem_limit_bytes=vmem_limit,
        ),
        cost_estimate=cost,
    )(x2, scale2, shift2)

    return out2.reshape(N, C, H, W)


def _reference(x, weight, bias, running_mean, running_var, eps):
    # Pure-JAX reference matching the PyTorch forward exactly.
    scale = weight * jax.lax.rsqrt(running_var + eps)
    shift = bias - running_mean * scale
    C = weight.shape[0]
    return x * scale.reshape(1, C, 1, 1) + shift.reshape(1, C, 1, 1)


if __name__ == "__main__":
    key = jax.random.PRNGKey(0)
    eps = 1e-5
    ok = True

    # Two small shapes: one lane-dense (H*W % 128 == 0) and one ragged (7x7),
    # exercising both kernel layouts.
    for (N, C, H, W) in [(2, 4, 16, 16), (2, 4, 7, 7)]:
        key, kx, kw, kb, km, kv = jax.random.split(key, 6)
        x = jax.random.normal(kx, (N, C, H, W), dtype=jnp.float32)
        # Module __init__ is the identity transform; perturb the buffers so all
        # four parameters are exercised.
        weight = 1.0 + 0.1 * jax.random.normal(kw, (C,), dtype=jnp.float32)
        bias = 0.1 * jax.random.normal(kb, (C,), dtype=jnp.float32)
        running_mean = 0.05 * jax.random.normal(km, (C,), dtype=jnp.float32)
        running_var = (jnp.ones((C,), jnp.float32) - eps
                       + 0.1 * jnp.abs(jax.random.normal(kv, (C,), jnp.float32)))

        y = frozen_batch_norm_2d(x, weight, bias, running_mean, running_var, eps)
        y = jax.block_until_ready(y)
        y_ref = _reference(x, weight, bias, running_mean, running_var, eps)

        ok &= (y.shape == x.shape and y.dtype == x.dtype)
        ok &= bool(jnp.allclose(y, y_ref, atol=1e-5, rtol=1e-5))

    assert ok
    print("KERNEL_OK")
</pallas_src>

<mosaic_0001>
module attributes {stable_mosaic.version = 11 : i64} {
  func.func @_fma_kernel(%arg0: i32, %arg1: memref<8x256xf32, #tpu.memory_space<vmem>>, %arg2: memref<8x1xf32, #tpu.memory_space<vmem>>, %arg3: memref<8x1xf32, #tpu.memory_space<vmem>>, %arg4: memref<8x256xf32, #tpu.memory_space<vmem>>) attributes {dimension_semantics = [#tpu.dimension_semantics<parallel>], iteration_bounds = array<i64: 1>, scalar_prefetch = 0 : i64, scratch_operands = 0 : i64, tpu.core_type = #tpu.core_type<tc>, window_params = [{transform_indices = @transform_0, window_bounds = array<i64: 8, 256>}, {transform_indices = @transform_1, window_bounds = array<i64: 8, 1>}, {transform_indices = @transform_2, window_bounds = array<i64: 8, 1>}, {transform_indices = @transform_3, window_bounds = array<i64: 8, 256>}]} {
    %c0 = arith.constant 0 : index
    %c0_0 = arith.constant 0 : index
    %0 = vector.load %arg1[%c0, %c0_0] : memref<8x256xf32, #tpu.memory_space<vmem>>, vector<8x256xf32>
    %c0_1 = arith.constant 0 : index
    %c0_2 = arith.constant 0 : index
    %1 = vector.load %arg2[%c0_1, %c0_2] : memref<8x1xf32, #tpu.memory_space<vmem>>, vector<8x1xf32>
    %2 = vector.broadcast %1 : vector<8x1xf32> to vector<8x256xf32>
    %3 = arith.mulf %0, %2 : vector<8x256xf32>
    %c0_3 = arith.constant 0 : index
    %c0_4 = arith.constant 0 : index
    %4 = vector.load %arg3[%c0_3, %c0_4] : memref<8x1xf32, #tpu.memory_space<vmem>>, vector<8x1xf32>
    %5 = vector.broadcast %4 : vector<8x1xf32> to vector<8x256xf32>
    %6 = arith.addf %3, %5 : vector<8x256xf32>
    %c0_5 = arith.constant 0 : index
    %c0_6 = arith.constant 0 : index
    %7 = vector.load %arg4[%c0_5, %c0_6] : memref<8x256xf32, #tpu.memory_space<vmem>>, vector<8x256xf32>
    tpu.vector_store %arg4[%c0_5, %c0_6], %6 {strides = array<i32>} : memref<8x256xf32, #tpu.memory_space<vmem>>, vector<8x256xf32>,
    return
  }
  func.func @transform_0(%arg0: i32) -> (i32, i32) {
    %c0_i32 = arith.constant 0 : i32
    %c0_i32_0 = arith.constant 0 : i32
    return %arg0, %c0_i32 : i32, i32
  }
  func.func @transform_1(%arg0: i32) -> (i32, i32) {
    %c0_i32 = arith.constant 0 : i32
    %c0_i32_0 = arith.constant 0 : i32
    return %arg0, %c0_i32 : i32, i32
  }
  func.func @transform_2(%arg0: i32) -> (i32, i32) {
    %c0_i32 = arith.constant 0 : i32
    %c0_i32_0 = arith.constant 0 : i32
    return %arg0, %c0_i32 : i32, i32
  }
  func.func @transform_3(%arg0: i32) -> (i32, i32) {
    %c0_i32 = arith.constant 0 : i32
    %c0_i32_0 = arith.constant 0 : i32
    return %arg0, %c0_i32 : i32, i32
  }
}

</mosaic_0001>

<bundles_post_ra>
// kernel: tpu_custom_call.1
= control target key start
LH: loop header
LB: loop body
LE: loop exit
PB: predicated region body
PF: predicated region fallthrough
CT: control target
= control target key end

     0   :  { %s122_s0 = inlined_call_operand.vmem [shape: f32[8,256], index: 0, kind: input, shape index: {}]   ;;  %s123_s1 = inlined_call_operand.vmem [shape: f32[8,1], index: 1, kind: input, shape index: {}]   ;;  %s124_s2 = inlined_call_operand.vmem [shape: f32[8,1], index: 2, kind: input, shape index: {}]   ;;  %s125_s3 = inlined_call_operand.hbm [shape: f32[8,256], index: 3, kind: output, shape index: {}]  }
   0x1   :  { %v17_v0 = vld [vmem:[%s123_s1] sm:$0xff] }
   0x2   :  { %8 = vsyncpa [#allocation3], 0  ;;  %v76_v1 = vmov 0   ;;  %v25_v2 = vld [vmem:[%s124_s2] sm:$0xff]  ;;  %v16_v5 = vld [vmem:[%s122_s0 + $0x8] sm:$0xff]  ;;  %s77_s20 = smov [#allocation2]  }
   0x3   :  { %51 = vset.pattern.permute.xlu0 %v76_v1  ;;  %v15_v4 = vld [vmem:[%s122_s0] sm:$0xff]  ;;  %s41_s1 = sshll.u32 %s77_s20, 4  ;;  %s42_s1 = int_to_ptr.vmem [resolvable:$true] %s41_s1 }
   0x4   :  { %20 = vperm.xlu0 %51, %v17_v0   ;;  %s52_s2 = scalar_lea.vmem %s42_s1, 256  ;;  %p57_p1 = scmp.lt.s32.totalorder %s42_s1, %s42_s1 }
   0x5   :  { %p53_p0 = scmp.ne.s32.totalorder %s42_s1, %s52_s2  ;;  %p58_p2 = scmp.lt.s32.totalorder %s52_s2, %s52_s2 }
   0x7   :  { %p59_p3 = por %p58_p2, %p57_p1 }
   0x8   :  { %28 = vperm.xlu0 %51, %v25_v2  }
   0x9   :  { %p60_p4 = pnand %p59_p3, %p53_p0 }
  0x83   :  { %v21_v3 = vpop.permute.xlu0 %20 }
  0x84   :  { %v23_v6 = vmul.f32 %v21_v3, %v15_v4  ;;  %v24_v7 = vmul.f32 %v21_v3, %v16_v5 }
  0x87   :  { %v29_v8 = vpop.permute.xlu0 %28 }
  0x88   :  { %v31_v9 = vadd.f32 %v29_v8, %v23_v6  ;;  %v32_v10 = vadd.f32 %v29_v8, %v24_v7 }
  0x8a   :  { %33 = vst [vmem:[#allocation2] sm:$0xff] %v31_v9  ;;  %34 = vst [vmem:[#allocation2 + $0x8] sm:$0xff] %v32_v10 }
  0x8b   :  { %63 = shalt.err (!%p60_p4)
}
  0x8c   :  { %s64_s0 = scalar_lea.hbm %s125_s3, 256 }
  0x8d   :  { %p65_p5 = scmp.ne.s32.totalorder %s125_s3, %s64_s0  ;;  %p68_p6 = scmp.lt.u32.totalorder %s64_s0, %s125_s3 }
  0x8f   :  { %p70_p7 = pnand %p68_p6, %p65_p5 }
  0x91   :  { %73 = shalt.err (!%p70_p7)
}
  0x92   :  { %44 = dma.vmem_to_hbm [thread:$0]  %s42_s1, 256, %s125_s3, [#allocation3]  }
  0x93   :  { %74 = dma.done.wait [#allocation3], 256  }
  0x94   :  { %75 = vsyncadd [#allocation3], 4294967040 }
  0x95   :  { %48 = vsyncpa [#allocation3], 1 }

</bundles_post_ra>
